<compile_context>
chip_gen: v7x
topology: tpu7x:2x2x1
jax: 0.10.0
libtpu: 0.0.40
codegen_flags: <defaults>
</compile_context>

<pallas_src>
import functools

import jax
import jax.numpy as jnp
from jax.experimental import pallas as pl
from jax.experimental.pallas import tpu as pltpu


def _odefunc_list_kernel(t_ref, x_ref, w1_ref, wt_ref, b1_ref, w2_ref, b2_ref,
                         o_ref, *, bf16_tanh):
    # t_ref : SMEM (1,) scalar time
    # x_ref : (tb, D) batch tile of tpp_state, D = n_funcs * H
    # w1_ref: (n_funcs, H, W)  bf16     wt_ref: (n_funcs, 1, W) f32
    # b1_ref: (n_funcs, 1, W)  f32      w2_ref: (n_funcs, W, H) bf16
    # b2_ref: (n_funcs, 1, H)  f32
    # o_ref : (tb, D)
    t = t_ref[0]
    n_funcs, H, _ = w1_ref.shape

    # Statically unrolled loop over odefuncs (n_funcs is small) — one pair of
    # MXU matmuls per func, all inside a single grid step. Each func's result
    # is stored directly into its disjoint lane-aligned output slice, so only
    # one (tb, H) result is live at a time (no end-of-loop concat / spills).
    for i in range(n_funcs):
        h = x_ref[:, i * H:(i + 1) * H].astype(w1_ref.dtype)
        pre = jnp.dot(h, w1_ref[i], preferred_element_type=jnp.float32)
        # Group the (1, W) terms first: one tiny add + one full-tile add.
        pre = pre + (t * wt_ref[i] + b1_ref[i])
        if bf16_tanh:
            # bf16 EUP path (v6e/v7x); activation is cast to bf16 anyway.
            act = jnp.tanh(pre.astype(jnp.bfloat16)).astype(w2_ref.dtype)
        else:
            act = jnp.tanh(pre).astype(w2_ref.dtype)
        d = jnp.dot(act, w2_ref[i], preferred_element_type=jnp.float32) + b2_ref[i]
        o_ref[:, i * H:(i + 1) * H] = d.astype(o_ref.dtype)


def hidden_state_odefunc_list(t, tpp_state, params, *, weight_dtype=jnp.bfloat16,
                              tb=None, bf16_tanh=False):
    """Forward pass of HiddenStateODEFuncList.

    t:          scalar float
    tpp_state:  (B, D) with D = n_funcs * H
    params:     dict of stacked per-func weights:
                w1 (n_funcs, H, W), wt (n_funcs, 1, W), b1 (n_funcs, 1, W),
                w2 (n_funcs, W, H), b2 (n_funcs, 1, H)
    returns:    (B, D)
    """
    w1 = params["w1"].astype(weight_dtype)
    w2 = params["w2"].astype(weight_dtype)
    wt = params["wt"].astype(jnp.float32)
    b1 = params["b1"].astype(jnp.float32)
    b2 = params["b2"].astype(jnp.float32)

    n_funcs, H, W = w1.shape
    B, D = tpp_state.shape
    assert D == n_funcs * H, "last dim must split evenly across odefuncs"
    assert H % 128 == 0, "per-func hidden width must be lane-aligned (multiple of 128)"

    # Batch tile: big enough to amortize per-step overhead, but prefer >= 2
    # batch tiles so v7x can shard the "parallel" batch axis across its two
    # TensorCores. Fall back to the largest divisor / full batch otherwise.
    if tb is None:
        tb = B
        chosen = None
        for cand in (512, 256, 128):
            if B % cand == 0 and B // cand >= 2:
                chosen = cand
                break
        if chosen is None:
            for cand in (512, 256, 128):
                if B % cand == 0:
                    chosen = cand
                    break
        if chosen is not None:
            tb = chosen
    assert B % tb == 0, "batch must divide evenly into batch tiles"

    t_arr = jnp.asarray(t, dtype=jnp.float32).reshape((1,))

    # Explicit VMEM budget: resident weights (double-buffered by default) plus
    # double-buffered x/out tiles, capped at 48 MiB so it is valid on v7x.
    wbytes = ((w1.size + w2.size) * jnp.dtype(weight_dtype).itemsize
              + (wt.size + b1.size + b2.size) * 4)
    iobytes = 2 * tb * D * jnp.dtype(tpp_state.dtype).itemsize
    vmem_limit = min(max(32 << 20, 2 * (wbytes + iobytes) + (2 << 20)), 48 << 20)

    grid_spec = pltpu.PrefetchScalarGridSpec(
        num_scalar_prefetch=0,
        grid=(B // tb,),
        in_specs=[
            pl.BlockSpec(memory_space=pltpu.MemorySpace.SMEM),          # t
            pl.BlockSpec((tb, D), lambda b: (b, 0)),                    # x batch tile
            pl.BlockSpec((n_funcs, H, W), lambda b: (0, 0, 0)),         # w1 (resident)
            pl.BlockSpec((n_funcs, 1, W), lambda b: (0, 0, 0)),         # wt
            pl.BlockSpec((n_funcs, 1, W), lambda b: (0, 0, 0)),         # b1
            pl.BlockSpec((n_funcs, W, H), lambda b: (0, 0, 0)),         # w2
            pl.BlockSpec((n_funcs, 1, H), lambda b: (0, 0, 0)),         # b2
        ],
        out_specs=pl.BlockSpec((tb, D), lambda b: (b, 0)),
    )

    return pl.pallas_call(
        functools.partial(_odefunc_list_kernel, bf16_tanh=bf16_tanh),
        out_shape=jax.ShapeDtypeStruct((B, D), tpp_state.dtype),
        grid_spec=grid_spec,
        compiler_params=pltpu.CompilerParams(
            dimension_semantics=("parallel",),
            vmem_limit_bytes=int(vmem_limit),
        ),
    )(t_arr, tpp_state, w1, wt, b1, w2, b2)


def hidden_state_odefunc_list_ref(t, tpp_state, params, weight_dtype=jnp.bfloat16):
    """Pure-JAX reference with the same bf16 weight/activation casts."""
    w1, wt, b1, w2, b2 = (params[k] for k in ("w1", "wt", "b1", "w2", "b2"))
    n_funcs, H, _ = w1.shape
    states = jnp.split(tpp_state, n_funcs, axis=-1)
    ds = []
    for i, s in enumerate(states):
        h = s.astype(weight_dtype)
        pre = jnp.dot(h, w1[i].astype(weight_dtype), preferred_element_type=jnp.float32)
        pre = pre + t * wt[i].astype(jnp.float32) + b1[i].astype(jnp.float32)
        act = jnp.tanh(pre).astype(weight_dtype)
        d = jnp.dot(act, w2[i].astype(weight_dtype), preferred_element_type=jnp.float32)
        ds.append(d + b2[i].astype(jnp.float32))
    return jnp.concatenate(ds, axis=-1).astype(tpp_state.dtype)


def make_params(key, n_funcs, hidden, width):
    ks = jax.random.split(key, 5)
    scale1 = 1.0 / jnp.sqrt(hidden + 1.0)
    scale2 = 1.0 / jnp.sqrt(float(width))
    return {
        "w1": jax.random.normal(ks[0], (n_funcs, hidden, width), jnp.float32) * scale1,
        "wt": jax.random.normal(ks[1], (n_funcs, 1, width), jnp.float32) * scale1,
        "b1": jax.random.normal(ks[2], (n_funcs, 1, width), jnp.float32) * 0.01,
        "w2": jax.random.normal(ks[3], (n_funcs, width, hidden), jnp.float32) * scale2,
        "b2": jax.random.normal(ks[4], (n_funcs, 1, hidden), jnp.float32) * 0.01,
    }


if __name__ == "__main__":
    key = jax.random.PRNGKey(0)
    k_params, k_state = jax.random.split(key)

    B = 8          # batch
    H = 128        # hidden width per odefunc (lane-aligned)
    W = 128        # MLP width inside each odefunc
    N_FUNCS = 2    # number of odefuncs in the list
    D = N_FUNCS * H

    params = make_params(k_params, N_FUNCS, H, W)
    tpp_state = jax.random.normal(k_state, (B, D), jnp.float32)
    t = 0.5

    out = hidden_state_odefunc_list(t, tpp_state, params)
    out = jax.block_until_ready(out)

    ref = hidden_state_odefunc_list_ref(t, tpp_state, params)
    assert out.shape == (B, D)
    assert jnp.allclose(out, ref, atol=1e-2, rtol=1e-2), "mismatch vs reference"

    print("KERNEL_OK")
</pallas_src>

<mosaic_0001>
module attributes {stable_mosaic.version = 11 : i64} {
  func.func @_odefunc_list_kernel(%arg0: i32, %arg1: memref<1xf32, #tpu.memory_space<smem>>, %arg2: memref<8x256xf32, #tpu.memory_space<vmem>>, %arg3: memref<2x128x128xbf16, #tpu.memory_space<vmem>>, %arg4: memref<2x1x128xf32, #tpu.memory_space<vmem>>, %arg5: memref<2x1x128xf32, #tpu.memory_space<vmem>>, %arg6: memref<2x128x128xbf16, #tpu.memory_space<vmem>>, %arg7: memref<2x1x128xf32, #tpu.memory_space<vmem>>, %arg8: memref<8x256xf32, #tpu.memory_space<vmem>>) attributes {dimension_semantics = [#tpu.dimension_semantics<parallel>], iteration_bounds = array<i64: 1>, scalar_prefetch = 0 : i64, scratch_operands = 0 : i64, tpu.core_type = #tpu.core_type<tc>, window_params = [{transform_indices = @transform_0, window_bounds = array<i64: 1>}, {transform_indices = @transform_1, window_bounds = array<i64: 8, 256>}, {pipeline_mode = #tpu.pipeline_mode<synchronous>, transform_indices = @transform_2, window_bounds = array<i64: 2, 128, 128>}, {pipeline_mode = #tpu.pipeline_mode<synchronous>, transform_indices = @transform_3, window_bounds = array<i64: 2, 1, 128>}, {pipeline_mode = #tpu.pipeline_mode<synchronous>, transform_indices = @transform_4, window_bounds = array<i64: 2, 1, 128>}, {pipeline_mode = #tpu.pipeline_mode<synchronous>, transform_indices = @transform_5, window_bounds = array<i64: 2, 128, 128>}, {pipeline_mode = #tpu.pipeline_mode<synchronous>, transform_indices = @transform_6, window_bounds = array<i64: 2, 1, 128>}, {transform_indices = @transform_7, window_bounds = array<i64: 8, 256>}]} {
    %c0 = arith.constant 0 : index
    %0 = memref.load %arg1[%c0] : memref<1xf32, #tpu.memory_space<smem>>
    %c0_0 = arith.constant 0 : index
    %c0_1 = arith.constant 0 : index
    %1 = vector.load %arg2[%c0_0, %c0_1] : memref<8x256xf32, #tpu.memory_space<vmem>>, vector<8x128xf32>
    %2 = arith.truncf %1 : vector<8x128xf32> to vector<8x128xbf16>
    %c0_2 = arith.constant 0 : index
    %c0_3 = arith.constant 0 : index
    %c0_4 = arith.constant 0 : index
    %3 = vector.load %arg3[%c0_2, %c0_3, %c0_4] : memref<2x128x128xbf16, #tpu.memory_space<vmem>>, vector<1x128x128xbf16>
    %4 = vector.shape_cast %3 : vector<1x128x128xbf16> to vector<128x128xbf16>
    %cst = arith.constant dense<0.000000e+00> : vector<8x128xf32>
    %5 = tpu.matmul %2, %4, %cst {dimension_numbers = #tpu.dot_dimension_numbers<[1], [0], [0], [1], [0, 0, 1, 1], [], []>} : vector<8x128xbf16>, vector<128x128xbf16>, vector<8x128xf32> -> vector<8x128xf32>
    %c0_5 = arith.constant 0 : index
    %c0_6 = arith.constant 0 : index
    %c0_7 = arith.constant 0 : index
    %6 = vector.load %arg4[%c0_5, %c0_6, %c0_7] : memref<2x1x128xf32, #tpu.memory_space<vmem>>, vector<1x1x128xf32>
    %7 = vector.shape_cast %6 : vector<1x1x128xf32> to vector<1x128xf32>
    %8 = vector.broadcast %0 : f32 to vector<1x128xf32>
    %9 = arith.mulf %8, %7 : vector<1x128xf32>
    %c0_8 = arith.constant 0 : index
    %c0_9 = arith.constant 0 : index
    %c0_10 = arith.constant 0 : index
    %10 = vector.load %arg5[%c0_8, %c0_9, %c0_10] : memref<2x1x128xf32, #tpu.memory_space<vmem>>, vector<1x1x128xf32>
    %11 = vector.shape_cast %10 : vector<1x1x128xf32> to vector<1x128xf32>
    %12 = arith.addf %9, %11 : vector<1x128xf32>
    %13 = vector.broadcast %12 : vector<1x128xf32> to vector<8x128xf32>
    %14 = arith.addf %5, %13 : vector<8x128xf32>
    %15 = math.tanh %14 : vector<8x128xf32>
    %16 = arith.truncf %15 : vector<8x128xf32> to vector<8x128xbf16>
    %c0_11 = arith.constant 0 : index
    %c0_12 = arith.constant 0 : index
    %c0_13 = arith.constant 0 : index
    %17 = vector.load %arg6[%c0_11, %c0_12, %c0_13] : memref<2x128x128xbf16, #tpu.memory_space<vmem>>, vector<1x128x128xbf16>
    %18 = vector.shape_cast %17 : vector<1x128x128xbf16> to vector<128x128xbf16>
    %cst_14 = arith.constant dense<0.000000e+00> : vector<8x128xf32>
    %19 = tpu.matmul %16, %18, %cst_14 {dimension_numbers = #tpu.dot_dimension_numbers<[1], [0], [0], [1], [0, 0, 1, 1], [], []>} : vector<8x128xbf16>, vector<128x128xbf16>, vector<8x128xf32> -> vector<8x128xf32>
    %c0_15 = arith.constant 0 : index
    %c0_16 = arith.constant 0 : index
    %c0_17 = arith.constant 0 : index
    %20 = vector.load %arg7[%c0_15, %c0_16, %c0_17] : memref<2x1x128xf32, #tpu.memory_space<vmem>>, vector<1x1x128xf32>
    %21 = vector.shape_cast %20 : vector<1x1x128xf32> to vector<1x128xf32>
    %22 = vector.broadcast %21 : vector<1x128xf32> to vector<8x128xf32>
    %23 = arith.addf %19, %22 : vector<8x128xf32>
    %c0_18 = arith.constant 0 : index
    %c0_19 = arith.constant 0 : index
    %24 = vector.load %arg8[%c0_18, %c0_19] : memref<8x256xf32, #tpu.memory_space<vmem>>, vector<8x128xf32>
    tpu.vector_store %arg8[%c0_18, %c0_19], %23 {strides = array<i32>} : memref<8x256xf32, #tpu.memory_space<vmem>>, vector<8x128xf32>,
    %c0_20 = arith.constant 0 : index
    %c128 = arith.constant 128 : index
    %25 = vector.load %arg2[%c0_20, %c128] : memref<8x256xf32, #tpu.memory_space<vmem>>, vector<8x128xf32>
    %26 = arith.truncf %25 : vector<8x128xf32> to vector<8x128xbf16>
    %c1 = arith.constant 1 : index
    %c0_21 = arith.constant 0 : index
    %c0_22 = arith.constant 0 : index
    %27 = vector.load %arg3[%c1, %c0_21, %c0_22] : memref<2x128x128xbf16, #tpu.memory_space<vmem>>, vector<1x128x128xbf16>
    %28 = vector.shape_cast %27 : vector<1x128x128xbf16> to vector<128x128xbf16>
    %cst_23 = arith.constant dense<0.000000e+00> : vector<8x128xf32>
    %29 = tpu.matmul %26, %28, %cst_23 {dimension_numbers = #tpu.dot_dimension_numbers<[1], [0], [0], [1], [0, 0, 1, 1], [], []>} : vector<8x128xbf16>, vector<128x128xbf16>, vector<8x128xf32> -> vector<8x128xf32>
    %c1_24 = arith.constant 1 : index
    %c0_25 = arith.constant 0 : index
    %c0_26 = arith.constant 0 : index
    %30 = vector.load %arg4[%c1_24, %c0_25, %c0_26] : memref<2x1x128xf32, #tpu.memory_space<vmem>>, vector<1x1x128xf32>
    %31 = vector.shape_cast %30 : vector<1x1x128xf32> to vector<1x128xf32>
    %32 = vector.broadcast %0 : f32 to vector<1x128xf32>
    %33 = arith.mulf %32, %31 : vector<1x128xf32>
    %c1_27 = arith.constant 1 : index
    %c0_28 = arith.constant 0 : index
    %c0_29 = arith.constant 0 : index
    %34 = vector.load %arg5[%c1_27, %c0_28, %c0_29] : memref<2x1x128xf32, #tpu.memory_space<vmem>>, vector<1x1x128xf32>
    %35 = vector.shape_cast %34 : vector<1x1x128xf32> to vector<1x128xf32>
    %36 = arith.addf %33, %35 : vector<1x128xf32>
    %37 = vector.broadcast %36 : vector<1x128xf32> to vector<8x128xf32>
    %38 = arith.addf %29, %37 : vector<8x128xf32>
    %39 = math.tanh %38 : vector<8x128xf32>
    %40 = arith.truncf %39 : vector<8x128xf32> to vector<8x128xbf16>
    %c1_30 = arith.constant 1 : index
    %c0_31 = arith.constant 0 : index
    %c0_32 = arith.constant 0 : index
    %41 = vector.load %arg6[%c1_30, %c0_31, %c0_32] : memref<2x128x128xbf16, #tpu.memory_space<vmem>>, vector<1x128x128xbf16>
    %42 = vector.shape_cast %41 : vector<1x128x128xbf16> to vector<128x128xbf16>
    %cst_33 = arith.constant dense<0.000000e+00> : vector<8x128xf32>
    %43 = tpu.matmul %40, %42, %cst_33 {dimension_numbers = #tpu.dot_dimension_numbers<[1], [0], [0], [1], [0, 0, 1, 1], [], []>} : vector<8x128xbf16>, vector<128x128xbf16>, vector<8x128xf32> -> vector<8x128xf32>
    %c1_34 = arith.constant 1 : index
    %c0_35 = arith.constant 0 : index
    %c0_36 = arith.constant 0 : index
    %44 = vector.load %arg7[%c1_34, %c0_35, %c0_36] : memref<2x1x128xf32, #tpu.memory_space<vmem>>, vector<1x1x128xf32>
    %45 = vector.shape_cast %44 : vector<1x1x128xf32> to vector<1x128xf32>
    %46 = vector.broadcast %45 : vector<1x128xf32> to vector<8x128xf32>
    %47 = arith.addf %43, %46 : vector<8x128xf32>
    %c0_37 = arith.constant 0 : index
    %c128_38 = arith.constant 128 : index
    %48 = vector.load %arg8[%c0_37, %c128_38] : memref<8x256xf32, #tpu.memory_space<vmem>>, vector<8x128xf32>
    tpu.vector_store %arg8[%c0_37, %c128_38], %47 {strides = array<i32>} : memref<8x256xf32, #tpu.memory_space<vmem>>, vector<8x128xf32>,
    return
  }
  func.func @transform_0(%arg0: i32) -> i32 {
    %c0_i32 = arith.constant 0 : i32
    %c0_i32_0 = arith.constant 0 : i32
    return %c0_i32 : i32
  }
  func.func @transform_1(%arg0: i32) -> (i32, i32) {
    %c0_i32 = arith.constant 0 : i32
    %c0_i32_0 = arith.constant 0 : i32
    return %arg0, %c0_i32 : i32, i32
  }
  func.func @transform_2(%arg0: i32) -> (i32, i32, i32) {
    %c0_i32 = arith.constant 0 : i32
    %c0_i32_0 = arith.constant 0 : i32
    %c0_i32_1 = arith.constant 0 : i32
    %c0_i32_2 = arith.constant 0 : i32
    return %c0_i32, %c0_i32_0, %c0_i32_1 : i32, i32, i32
  }
  func.func @transform_3(%arg0: i32) -> (i32, i32, i32) {
    %c0_i32 = arith.constant 0 : i32
    %c0_i32_0 = arith.constant 0 : i32
    %c0_i32_1 = arith.constant 0 : i32
    %c0_i32_2 = arith.constant 0 : i32
    return %c0_i32, %c0_i32_0, %c0_i32_1 : i32, i32, i32
  }
  func.func @transform_4(%arg0: i32) -> (i32, i32, i32) {
    %c0_i32 = arith.constant 0 : i32
    %c0_i32_0 = arith.constant 0 : i32
    %c0_i32_1 = arith.constant 0 : i32
    %c0_i32_2 = arith.constant 0 : i32
    return %c0_i32, %c0_i32_0, %c0_i32_1 : i32, i32, i32
  }
  func.func @transform_5(%arg0: i32) -> (i32, i32, i32) {
    %c0_i32 = arith.constant 0 : i32
    %c0_i32_0 = arith.constant 0 : i32
    %c0_i32_1 = arith.constant 0 : i32
    %c0_i32_2 = arith.constant 0 : i32
    return %c0_i32, %c0_i32_0, %c0_i32_1 : i32, i32, i32
  }
  func.func @transform_6(%arg0: i32) -> (i32, i32, i32) {
    %c0_i32 = arith.constant 0 : i32
    %c0_i32_0 = arith.constant 0 : i32
    %c0_i32_1 = arith.constant 0 : i32
    %c0_i32_2 = arith.constant 0 : i32
    return %c0_i32, %c0_i32_0, %c0_i32_1 : i32, i32, i32
  }
  func.func @transform_7(%arg0: i32) -> (i32, i32) {
    %c0_i32 = arith.constant 0 : i32
    %c0_i32_0 = arith.constant 0 : i32
    return %arg0, %c0_i32 : i32, i32
  }
}

</mosaic_0001>

<bundles_post_ra>
// kernel: tpu_custom_call.1
= control target key start
LH: loop header
LB: loop body
LE: loop exit
PB: predicated region body
PF: predicated region fallthrough
CT: control target
= control target key end

     0   :  { %13 = vsyncpa [#allocation4], 0  ;;  %s1005_s0 = inlined_call_operand.<no memory space> [shape: f32[1], index: 0, kind: input, shape index: {}]   ;;  %s1006_s1 = inlined_call_operand.hbm [shape: f32[8,256], index: 1, kind: input, shape index: {}]   ;;  %s1007_s2 = inlined_call_operand.hbm [shape: bf16[2,128,128], index: 2, kind: input, shape index: {}]   ;;  %s1008_s3 = inlined_call_operand.vmem [shape: f32[2,1,128], index: 3, kind: input, shape index: {}]   ;;  %s1009_s4 = inlined_call_operand.vmem [shape: f32[2,1,128], index: 4, kind: input, shape index: {}]   ;;  %s1010_s5 = inlined_call_operand.hbm [shape: bf16[2,128,128], index: 5, kind: input, shape index: {}]   ;;  %s1011_s6 = inlined_call_operand.vmem [shape: f32[2,1,128], index: 6, kind: input, shape index: {}]   ;;  %s1012_s7 = inlined_call_operand.hbm [shape: f32[8,256], index: 7, kind: output, shape index: {}]  }
   0x1   :  { %14 = vsyncpa [#allocation7], 0 }
   0x2   :  { %15 = vsyncpa [#allocation5], 0  ;;  %s842_s24 = smov [#allocation6]   ;;  %s748_s28 = scalar_lea.hbm %s1007_s2, 2048 }
   0x3   :  { %s33_s25 = sshll.u32 %s842_s24, 4  ;;  %p749_p0 = scmp.ne.s32.totalorder %s1007_s2, %s748_s28  ;;  %s34_s25 = int_to_ptr.vmem [resolvable:$true] %s33_s25 }
   0x4   :  { %p752_p1 = scmp.lt.u32.totalorder %s748_s28, %s1007_s2 }
   0x6   :  { %p754_p2 = pnand %p752_p1, %p749_p0 }
   0x8   :  { %757 = shalt.err (!%p754_p2)
}
   0x9   :  { %s758_s10 = scalar_lea.vmem %s34_s25, 2048  ;;  %p763_p4 = scmp.lt.s32.totalorder %s34_s25, %s34_s25 }
   0xa   :  { %p759_p3 = scmp.ne.s32.totalorder %s34_s25, %s758_s10  ;;  %p764_p5 = scmp.lt.s32.totalorder %s758_s10, %s758_s10 }
   0xc   :  { %p765_p6 = por %p764_p5, %p763_p4 }
   0xe   :  { %p766_p7 = pnand %p765_p6, %p759_p3 }
  0x10   :  { %769 = shalt.err (!%p766_p7)
}
  0x11   :  { %s843_s11 = smov 64   ;;  %s844_s12 = smov 4  }
  0x12   :  { %39 = dma.hbm_to_vmem [thread:$0]  %s1007_s2, 2048, %s34_s25, [#allocation7], %s843_s11, %s843_s11, %s844_s12  }
  0x13   :  { %s845_s15 = smov [#allocation3]   ;;  %s846_s17 = smov [#allocation8]  }
  0x14   :  { %s24_s16 = sshll.u32 %s845_s15, 4  ;;  %s49_s18 = sshll.u32 %s846_s17, 4  ;;  %s25_s16 = int_to_ptr.vmem [resolvable:$true] %s24_s16  ;;  %s50_s18 = int_to_ptr.vmem [resolvable:$true] %s49_s18 }
  0x15   :  { %s770_s21 = scalar_lea.hbm %s1006_s1, 256 }
  0x16   :  { %p771_p8 = scmp.ne.s32.totalorder %s1006_s1, %s770_s21  ;;  %p774_p9 = scmp.lt.u32.totalorder %s770_s21, %s1006_s1 }
  0x18   :  { %p776_p10 = pnand %p774_p9, %p771_p8 }
  0x1a   :  { %779 = shalt.err (!%p776_p10)
}
  0x1b   :  { %s780_s2 = scalar_lea.vmem %s25_s16, 256  ;;  %p785_p12 = scmp.lt.s32.totalorder %s25_s16, %s25_s16 }
  0x1c   :  { %p781_p11 = scmp.ne.s32.totalorder %s25_s16, %s780_s2  ;;  %p786_p13 = scmp.lt.s32.totalorder %s780_s2, %s780_s2 }
  0x1e   :  { %p787_p0 = por %p786_p13, %p785_p12 }
  0x20   :  { %p788_p1 = pnand %p787_p0, %p781_p11 }
  0x22   :  { %791 = shalt.err (!%p788_p1)
}
  0x23   :  { %27 = dma.hbm_to_vmem [thread:$0]  %s1006_s1, 256, %s25_s16, [#allocation4]  }
  0x24   :  { %s792_s30 = scalar_lea.hbm %s1010_s5, 2048 }
  0x25   :  { %p793_p2 = scmp.ne.s32.totalorder %s1010_s5, %s792_s30  ;;  %p796_p3 = scmp.lt.u32.totalorder %s792_s30, %s1010_s5 }
  0x27   :  { %p798_p4 = pnand %p796_p3, %p793_p2 }
  0x29   :  { %801 = shalt.err (!%p798_p4)
}
  0x2a   :  { %s802_s14 = scalar_lea.vmem %s50_s18, 2048  ;;  %p807_p6 = scmp.lt.s32.totalorder %s50_s18, %s50_s18 }
  0x2b   :  { %p803_p5 = scmp.ne.s32.totalorder %s50_s18, %s802_s14  ;;  %p808_p7 = scmp.lt.s32.totalorder %s802_s14, %s802_s14 }
  0x2d   :  { %p809_p8 = por %p808_p7, %p807_p6 }
  0x2f   :  { %p810_p9 = pnand %p809_p8, %p803_p5 }
  0x31   :  { %813 = shalt.err (!%p810_p9)
}
  0x32   :  { %55 = dma.hbm_to_vmem [thread:$0]  %s1010_s5, 2048, %s50_s18, [#allocation7], %s843_s11, %s843_s11, %s844_s12  }
  0x33   :  { %836 = dma.done.wait [#allocation4], 256  }
  0x34   :  { %837 = vsyncadd [#allocation4], 4294967040 }
  0x35   :  { %838 = dma.done.wait [#allocation7], 4096  }
  0x36   :  { %839 = vsyncadd [#allocation7], 4294963200  ;;  %v847_v0 = vmov 0.0   ;;  %vm848_vm0 = vmmov 0   ;;  %v712_v1 = vld [vmem:[#allocation6] sm:$0xff]   ;;  %v713_v2 = vld [vmem:[#allocation6 + $0x8] sm:$0xff]   ;;  %v93_v29 = vlaneseq  ;;  %v88_v31 = vstv %s1005_s0 }
  0x37   :  { %624 = vmatprep.subr.bf16.mxu0 %v847_v0  ;;  %640 = vmatprep.mubr.msk.bf16.mxu0 %vm848_vm0, %v847_v0  ;;  %v714_v3 = vld [vmem:[#allocation6 + $0x10] sm:$0xff]   ;;  %v715_v4 = vld [vmem:[#allocation6 + $0x18] sm:$0xff]   ;;  %v716_v5 = vld [vmem:[#allocation6 + $0x20] sm:$0xff]   ;;  %s849_s24 = smov [#allocation9]  }
  0x38   :  { %644 = vmatprep.subr.bf16.mxu1 %v847_v0  ;;  %660 = vmatprep.mubr.msk.bf16.mxu1 %vm848_vm0, %v847_v0  ;;  %v728_v6 = vld [vmem:[#allocation8] sm:$0xff]   ;;  %v717_v7 = vld [vmem:[#allocation6 + $0x28] sm:$0xff]   ;;  %v718_v9 = vld [vmem:[#allocation6 + $0x30] sm:$0xff]   ;;  %v94_v33 = vshrl.u32 %v93_v29, 7  ;;  %s541_s26 = sshll.u32 %s849_s24, 4  ;;  %s542_s26 = int_to_ptr.vmem [resolvable:$true] %s541_s26 }
  0x39   :  { %625 = vmatpush3.bf16.msra.mxu0 %v712_v1  ;;  %645 = vmatpush3.bf16.msra.mxu1 %v728_v6  ;;  %v729_v8 = vld [vmem:[#allocation8 + $0x8] sm:$0xff]   ;;  %v730_v10 = vld [vmem:[#allocation8 + $0x10] sm:$0xff]   ;;  %v719_v11 = vld [vmem:[#allocation6 + $0x38] sm:$0xff]   ;;  %s814_s2 = scalar_lea.vmem %s542_s26, 256  ;;  %p819_p11 = scmp.lt.s32.totalorder %s542_s26, %s542_s26 }
  0x3a   :  { %626 = vmatprep.subr.bf16.mxu0 %v847_v0  ;;  %646 = vmatprep.subr.bf16.mxu1 %v847_v0  ;;  %v69_v12 = vld [vmem:[#allocation3] sm:$0xff]  ;;  %v731_v13 = vld [vmem:[#allocation8 + $0x18] sm:$0xff]   ;;  %v720_v15 = vld [vmem:[#allocation6 + $0x40] sm:$0xff]   ;;  %v95_v36 = vsub.s32 0, %v94_v33  ;;  %p815_p10 = scmp.ne.s32.totalorder %s542_s26, %s814_s2  ;;  %p820_p12 = scmp.lt.s32.totalorder %s814_s2, %s814_s2 }
  0x3b   :  { %v70_v14 = vpack.c.bf16 %v69_v12, %v69_v12  ;;  %v721_v16 = vld [vmem:[#allocation6 + $0x48] sm:$0xff]   ;;  %v722_v17 = vld [vmem:[#allocation6 + $0x50] sm:$0xff]   ;;  %v723_v18 = vld [vmem:[#allocation6 + $0x58] sm:$0xff]  }
  0x3c   :  { %v724_v19 = vld [vmem:[#allocation6 + $0x60] sm:$0xff]   ;;  %v725_v20 = vld [vmem:[#allocation6 + $0x68] sm:$0xff]   ;;  %v726_v21 = vld [vmem:[#allocation6 + $0x70] sm:$0xff]   ;;  %p821_p13 = por %p820_p12, %p819_p11 }
  0x3d   :  { %627 = vmatpush3.bf16.msra.mxu0 %v713_v2  ;;  %647 = vmatpush3.bf16.msra.mxu1 %v729_v8  ;;  %v727_v22 = vld [vmem:[#allocation6 + $0x78] sm:$0xff]   ;;  %v732_v25 = vld [vmem:[#allocation8 + $0x20] sm:$0xff]   ;;  %v733_v26 = vld [vmem:[#allocation8 + $0x28] sm:$0xff]  }
  0x3e   :  { %628 = vmatprep.subr.bf16.mxu0 %v847_v0  ;;  %648 = vmatprep.subr.bf16.mxu1 %v847_v0  ;;  %v300_v23 = vld [vmem:[#allocation3 + $0x8] sm:$0xff]  ;;  %v734_v27 = vld [vmem:[#allocation8 + $0x30] sm:$0xff]   ;;  %v736_v44 = vld [vmem:[#allocation8 + $0x40] sm:$0xff]   ;;  %p822_p0 = pnand %p821_p13, %p815_p10 }
  0x3f   :  { %v301_v24 = vpack.c.bf16 %v300_v23, %v300_v23  ;;  %v735_v28 = vld [vmem:[#allocation8 + $0x38] sm:$0xff]   ;;  %v87_v30 = vld [vmem:[%s1008_s3] sm:$0x1]  ;;  %v737_v46 = vld [vmem:[#allocation8 + $0x48] sm:$0xff]  }
  0x40   :  { %v89_v32 = vmul.f32 %v88_v31, %v87_v30  ;;  %v90_v34 = vld [vmem:[%s1009_s4] sm:$0x1]  ;;  %v568_v47 = vld [vmem:[%s1008_s3 + $0x1] sm:$0x1]  ;;  %v739_v51 = vld [vmem:[#allocation8 + $0x58] sm:$0xff]  }
  0x41   :  { %629 = vmatpush3.bf16.msra.mxu0 %v714_v3  ;;  %649 = vmatpush3.bf16.msra.mxu1 %v730_v10  ;;  %v738_v48 = vld [vmem:[#allocation8 + $0x50] sm:$0xff]   ;;  %v321_v49 = vmul.f32 %v568_v47, %v88_v31  ;;  %v740_v54 = vld [vmem:[#allocation8 + $0x60] sm:$0xff]   ;;  %v741_v58 = vld [vmem:[#allocation8 + $0x68] sm:$0xff]  }
  0x42   :  { %630 = vmatprep.subr.bf16.mxu0 %v847_v0  ;;  %650 = vmatprep.subr.bf16.mxu1 %v847_v0  ;;  %v91_v35 = vadd.f32 %v90_v34, %v89_v32  ;;  %v569_v50 = vld [vmem:[%s1009_s4 + $0x1] sm:$0x1]  ;;  %v743_v62 = vld [vmem:[#allocation8 + $0x78] sm:$0xff]   ;;  %v559_v2 = vld [vmem:[%s1011_s6] ss:$0 sm:$0xff] }
  0x43   :  { %v324_v52 = vadd.f32 %v569_v50, %v321_v49  ;;  %v742_v61 = vld [vmem:[#allocation8 + $0x70] sm:$0xff]  }
  0x44   :  { %v96_v37 = vrot.slane %v91_v35, %v95_v36  ;;  %v579_v8 = vld [vmem:[%s1011_s6 + $0x1] ss:$0 sm:$0xff] }
  0x45   :  { %631 = vmatpush3.bf16.msra.mxu0 %v715_v4  ;;  %651 = vmatpush3.bf16.msra.mxu1 %v731_v13  ;;  %v329_v53 = vrot.slane %v324_v52, %v95_v36 }
  0x46   :  { %632 = vmatprep.subr.bf16.mxu0 %v847_v0  ;;  %652 = vmatprep.subr.bf16.mxu1 %v847_v0 }
  0x49   :  { %633 = vmatpush3.bf16.msra.mxu0 %v716_v5  ;;  %653 = vmatpush3.bf16.msra.mxu1 %v732_v25 }
  0x4a   :  { %634 = vmatprep.subr.bf16.mxu0 %v847_v0  ;;  %654 = vmatprep.subr.bf16.mxu1 %v847_v0 }
  0x4d   :  { %635 = vmatpush3.bf16.msra.mxu0 %v717_v7  ;;  %655 = vmatpush3.bf16.msra.mxu1 %v733_v26 }
  0x4e   :  { %636 = vmatprep.subr.bf16.mxu0 %v847_v0  ;;  %656 = vmatprep.subr.bf16.mxu1 %v847_v0 }
  0x51   :  { %637 = vmatpush3.bf16.msra.mxu0 %v718_v9  ;;  %657 = vmatpush3.bf16.msra.mxu1 %v734_v27 }
  0x52   :  { %638 = vmatprep.subr.bf16.mxu0 %v847_v0  ;;  %658 = vmatprep.subr.bf16.mxu1 %v847_v0 }
  0x55   :  { %639 = vmatpush3.bf16.msra.mxu0 %v719_v11  ;;  %659 = vmatpush3.bf16.msra.mxu1 %v735_v28 }
  0x56   :  { %664 = vmatprep.subr.bf16.mxu0 %v847_v0  ;;  %684 = vmatprep.subr.bf16.mxu1 %v847_v0 }
  0x58   :  { %641 = vmatmul.mubr.bf16.vlgmr.msra.gmra.mrb[0].mxu0 %v70_v14 }
  0x59   :  { %665 = vmatpush3.bf16.msra.mxu0 %v720_v15  ;;  %680 = vmatprep.mubr.msk.bf16.mxu0 %vm848_vm0, %v847_v0 }
  0x5a   :  { %666 = vmatprep.subr.bf16.mxu0 %v847_v0 }
  0x5d   :  { %667 = vmatpush3.bf16.msra.mxu0 %v721_v16 }
  0x5e   :  { %668 = vmatprep.subr.bf16.mxu0 %v847_v0 }
  0x61   :  { %669 = vmatpush3.bf16.msra.mxu0 %v722_v17 }
  0x62   :  { %670 = vmatprep.subr.bf16.mxu0 %v847_v0 }
  0x65   :  { %671 = vmatpush3.bf16.msra.mxu0 %v723_v18 }
  0x66   :  { %672 = vmatprep.subr.bf16.mxu0 %v847_v0 }
  0x69   :  { %673 = vmatpush3.bf16.msra.mxu0 %v724_v19 }
  0x6a   :  { %674 = vmatprep.subr.bf16.mxu0 %v847_v0 }
  0x6d   :  { %675 = vmatpush3.bf16.msra.mxu0 %v725_v20 }
  0x6e   :  { %676 = vmatprep.subr.bf16.mxu0 %v847_v0 }
  0x71   :  { %677 = vmatpush3.bf16.msra.mxu0 %v726_v21 }
  0x72   :  { %678 = vmatprep.subr.bf16.mxu0 %v847_v0 }
  0x75   :  { %679 = vmatpush3.bf16.msra.mxu0 %v727_v22 }
  0x78   :  { %681 = vmatmul.mubr.bf16.vlgmr.msra.gmra.mrb[4].mxu0 %v301_v24 }
 0x12b   :  { %v180_v38 = vpop.f32.mrb[0].mxu0 }
 0x12c   :  { %v181_v39 = vadd.f32 %v180_v38, %v96_v37  ;;  %v642_v40 = vpop.f32.mrb[1].mxu0 }
 0x12d   :  { %v183_v41 = vpop.f32.mrb[2].mxu0 }
 0x12e   :  { %744 = vtanh.f32 %v181_v39  ;;  %v643_v42 = vpop.f32.mrb[3].mxu0 }
 0x138   :  { %v745_v43 = vpop.eup %744 }
 0x139   :  { %v187_v45 = vpack.c.bf16 %v745_v43, %v745_v43 }
 0x13b   :  { %661 = vmatmul.mubr.bf16.vlgmr.msra.gmra.mrb[0].mxu1 %v187_v45 }
 0x13c   :  { %685 = vmatpush3.bf16.msra.mxu1 %v736_v44  ;;  %700 = vmatprep.mubr.msk.bf16.mxu1 %vm848_vm0, %v847_v0 }
 0x13d   :  { %686 = vmatprep.subr.bf16.mxu1 %v847_v0 }
 0x140   :  { %687 = vmatpush3.bf16.msra.mxu1 %v737_v46 }
 0x141   :  { %688 = vmatprep.subr.bf16.mxu1 %v847_v0 }
 0x144   :  { %689 = vmatpush3.bf16.msra.mxu1 %v738_v48 }
 0x145   :  { %690 = vmatprep.subr.bf16.mxu1 %v847_v0 }
 0x148   :  { %691 = vmatpush3.bf16.msra.mxu1 %v739_v51 }
 0x149   :  { %692 = vmatprep.subr.bf16.mxu1 %v847_v0 }
 0x14b   :  { %v413_v55 = vpop.f32.mrb[4].mxu0 }
 0x14c   :  { %v414_v56 = vadd.f32 %v413_v55, %v329_v53  ;;  %v682_v57 = vpop.f32.mrb[5].mxu0  ;;  %693 = vmatpush3.bf16.msra.mxu1 %v740_v54 }
 0x14d   :  { %v416_v59 = vpop.f32.mrb[6].mxu0  ;;  %694 = vmatprep.subr.bf16.mxu1 %v847_v0 }
 0x14e   :  { %746 = vtanh.f32 %v414_v56  ;;  %v683_v60 = vpop.f32.mrb[7].mxu0 }
 0x150   :  { %695 = vmatpush3.bf16.msra.mxu1 %v741_v58 }
 0x151   :  { %696 = vmatprep.subr.bf16.mxu1 %v847_v0 }
 0x154   :  { %697 = vmatpush3.bf16.msra.mxu1 %v742_v61 }
 0x155   :  { %698 = vmatprep.subr.bf16.mxu1 %v847_v0 }
 0x158   :  { %v747_v63 = vpop.eup %746  ;;  %699 = vmatpush3.bf16.msra.mxu1 %v743_v62 }
 0x159   :  { %v420_v1 = vpack.c.bf16 %v747_v63, %v747_v63 }
 0x15b   :  { %701 = vmatmul.mubr.bf16.vlgmr.msra.gmra.mrb[4].mxu1 %v420_v1 }
 0x20e   :  { %v293_v3 = vpop.f32.mrb[0].mxu1 }
 0x20f   :  { %v294_v4 = vadd.f32 %v559_v2, %v293_v3  ;;  %v662_v5 = vpop.f32.mrb[1].mxu1 }
 0x210   :  { %v296_v6 = vpop.f32.mrb[2].mxu1 }
 0x211   :  { %299 = vst [vmem:[#allocation9] sm:$0xff] %v294_v4  ;;  %v663_v7 = vpop.f32.mrb[3].mxu1 }
 0x22e   :  { %v528_v0 = vpop.f32.mrb[4].mxu1 }
 0x22f   :  { %v529_v9 = vadd.f32 %v579_v8, %v528_v0  ;;  %v702_v10 = vpop.f32.mrb[5].mxu1 }
 0x230   :  { %v531_v11 = vpop.f32.mrb[6].mxu1 }
 0x231   :  { %534 = vst [vmem:[#allocation9 + $0x8] sm:$0xff] %v529_v9  ;;  %v703_v12 = vpop.f32.mrb[7].mxu1 }
 0x232   :  { %825 = shalt.err (!%p822_p0)
}
 0x233   :  { %s826_s6 = scalar_lea.hbm %s1012_s7, 256 }
 0x234   :  { %p827_p1 = scmp.ne.s32.totalorder %s1012_s7, %s826_s6  ;;  %p830_p2 = scmp.lt.u32.totalorder %s826_s6, %s1012_s7 }
 0x236   :  { %p832_p3 = pnand %p830_p2, %p827_p1 }
 0x238   :  { %835 = shalt.err (!%p832_p3)
}
 0x239   :  { %544 = dma.vmem_to_hbm [thread:$0]  %s542_s26, 256, %s1012_s7, [#allocation5]  }
 0x23a   :  { %840 = dma.done.wait [#allocation5], 256  }
 0x23b   :  { %841 = vsyncadd [#allocation5], 4294967040 }
 0x23c   :  { %548 = vsyncpa [#allocation4], 1 }
 0x23d   :  { %549 = vsyncpa [#allocation7], 1 }
 0x23e   :  { %550 = vsyncpa [#allocation5], 1 }

</bundles_post_ra>
